<compile_context>
chip_gen: v7x
topology: tpu7x:2x2x1
jax: 0.10.0
libtpu: 0.0.40
codegen_flags: <defaults>
</compile_context>

<pallas_src>
import jax
import jax.numpy as jnp
from jax.experimental import pallas as pl
from jax.experimental.pallas import tpu as pltpu


def _tree_decoder2_kernel(x_ref, w1_ref, b1_ref, w2_ref, b2_ref, o_ref):
    # x_ref:  (bm, P*H)     packed input rows for this grid step
    # w1_ref: (P*H, P*D2)   block-diag of P copies of W1^T (resident)
    # b1_ref: (1, P*D2)     tiled bias
    # w2_ref: (P*D2, P*Do)  block-diag of P copies of W2^T (resident)
    # b2_ref: (1, P*Do)     tiled bias
    # o_ref:  (bm, P*Do)
    y1 = jnp.dot(x_ref[...], w1_ref[...], preferred_element_type=jnp.float32)
    y1 = y1 + b1_ref[...]
    y2 = jnp.dot(y1, w2_ref[...], preferred_element_type=jnp.float32)
    y2 = y2 + b2_ref[...]
    # Stable logistic; exp goes to the EUP slot, store is lane-dense.
    o_ref[...] = jax.nn.sigmoid(y2).astype(o_ref.dtype)


def _round_up(n, m):
    return -(-n // m) * m


def _block_diag(w, p):
    """(a, b) -> (p*a, p*b) with p copies of w along the diagonal (wrapper-side)."""
    a, b = w.shape
    eye = jnp.eye(p, dtype=w.dtype)
    return (eye[:, None, :, None] * w[None, :, None, :]).reshape(p * a, p * b)


def tree_decoder2_forward(encs, W1, b1, W2, b2, *, block_rows=1024):
    """Pallas TPU forward pass for TreeDecoder2.

    encs: (..., h_size) float32
    W1:   (2*output_size, h_size)       b1: (2*output_size,)
    W2:   (output_size, 2*output_size)  b2: (output_size,)
    returns: (..., output_size) float32

    block_rows is measured in *packed* rows (each packed row = P original rows).
    """
    *lead, H = encs.shape
    D2 = W1.shape[0]
    Do = W2.shape[0]
    assert W1.shape == (D2, H)
    assert b1.shape == (D2,)
    assert W2.shape == (Do, D2)
    assert b2.shape == (Do,)

    x = jnp.asarray(encs, jnp.float32).reshape(-1, H)
    N = x.shape[0]

    # Lane-pack P rows per packed row when the feature dims are lane-sparse
    # (< 128 lanes); this makes every load/store dense and 8x fewer rows.
    P = 8 if max(H, D2, Do) <= 128 else 1

    # Fold transposes / block-diag / tiling out of the kernel (done once by XLA).
    w1t = jnp.asarray(W1, jnp.float32).T            # (H, D2)
    w2t = jnp.asarray(W2, jnp.float32).T            # (D2, Do)
    if P > 1:
        w1k = _block_diag(w1t, P)                   # (P*H, P*D2)
        w2k = _block_diag(w2t, P)                   # (P*D2, P*Do)
        b1k = jnp.tile(jnp.asarray(b1, jnp.float32), P).reshape(1, P * D2)
        b2k = jnp.tile(jnp.asarray(b2, jnp.float32), P).reshape(1, P * Do)
    else:
        w1k, w2k = w1t, w2t
        b1k = jnp.asarray(b1, jnp.float32).reshape(1, D2)
        b2k = jnp.asarray(b2, jnp.float32).reshape(1, Do)

    # Pad rows to a multiple of P, then pack (row-major reshape, free).
    Np = _round_up(max(N, 1), P)
    if Np != N:
        x = jnp.pad(x, ((0, Np - N), (0, 0)))
    xp = x.reshape(Np // P, P * H)
    Npk = xp.shape[0]

    # Packed-row block: as large as possible (>= ~1 MiB of x per grid step),
    # but keep >= 2 grid steps when there is enough work so both v7x
    # TensorCores get a share under dimension_semantics=("parallel",).
    if Npk > block_rows:
        bm = block_rows
    elif Npk >= 16:
        bm = _round_up((Npk + 1) // 2, 8)
    else:
        bm = Npk

    Npk_pad = _round_up(Npk, bm)
    if Npk_pad != Npk:
        xp = jnp.pad(xp, ((0, Npk_pad - Npk), (0, 0)))
    grid = (Npk_pad // bm,)

    out = pl.pallas_call(
        _tree_decoder2_kernel,
        out_shape=jax.ShapeDtypeStruct((Npk_pad, P * Do), jnp.float32),
        grid=grid,
        in_specs=[
            pl.BlockSpec((bm, P * H), lambda i: (i, 0)),       # packed input rows
            pl.BlockSpec((P * H, P * D2), lambda i: (0, 0)),   # W1^T blkdiag (resident)
            pl.BlockSpec((1, P * D2), lambda i: (0, 0)),       # b1 tiled     (resident)
            pl.BlockSpec((P * D2, P * Do), lambda i: (0, 0)),  # W2^T blkdiag (resident)
            pl.BlockSpec((1, P * Do), lambda i: (0, 0)),       # b2 tiled     (resident)
        ],
        out_specs=pl.BlockSpec((bm, P * Do), lambda i: (i, 0)),
        compiler_params=pltpu.CompilerParams(
            dimension_semantics=("parallel",)),
    )(xp, w1k, b1k, w2k, b2k)

    # Unpack (free row-major reshape), drop padded rows.
    out = out.reshape(Npk_pad * P, Do)[:N]
    return out.reshape(*lead, Do)


def tree_decoder2_reference(encs, W1, b1, W2, b2):
    """Pure-JAX reference matching the PyTorch module semantics."""
    y1 = encs @ W1.T + b1
    y2 = y1 @ W2.T + b2
    return jax.nn.sigmoid(y2)


if __name__ == "__main__":
    # Shapes consistent with the module: h_size=32, output_size=16.
    h_size, output_size = 32, 16

    key = jax.random.PRNGKey(0)
    k_x, k_w1, k_b1, k_w2, k_b2, k_x2 = jax.random.split(key, 6)

    W1 = 0.1 * jax.random.normal(k_w1, (output_size * 2, h_size), dtype=jnp.float32)
    b1 = 0.1 * jax.random.normal(k_b1, (output_size * 2,), dtype=jnp.float32)
    W2 = 0.1 * jax.random.normal(k_w2, (output_size, output_size * 2), dtype=jnp.float32)
    b2 = 0.1 * jax.random.normal(k_b2, (output_size,), dtype=jnp.float32)

    # Case 1: small batch of 8 encoded tree nodes (single packed row).
    encs = jax.random.normal(k_x, (8, h_size), dtype=jnp.float32)
    out = jax.block_until_ready(tree_decoder2_forward(encs, W1, b1, W2, b2))
    ref = tree_decoder2_reference(encs, W1, b1, W2, b2)
    assert out.shape == (8, output_size), out.shape
    assert bool(jnp.all((out > 0.0) & (out < 1.0)))
    assert jnp.allclose(out, ref, rtol=1e-5, atol=1e-5)

    # Case 2: ragged batch (exercises row padding, packing and a 2-step grid).
    encs2 = jax.random.normal(k_x2, (1003, h_size), dtype=jnp.float32)
    out2 = jax.block_until_ready(tree_decoder2_forward(encs2, W1, b1, W2, b2))
    ref2 = tree_decoder2_reference(encs2, W1, b1, W2, b2)
    assert out2.shape == (1003, output_size), out2.shape
    assert jnp.allclose(out2, ref2, rtol=1e-5, atol=1e-5)

    print("KERNEL_OK")
</pallas_src>

<mosaic_0001>
module attributes {stable_mosaic.version = 11 : i64} {
  func.func @_tree_decoder2_kernel(%arg0: i32, %arg1: memref<1x256xf32, #tpu.memory_space<vmem>>, %arg2: memref<256x256xf32, #tpu.memory_space<vmem>>, %arg3: memref<1x256xf32, #tpu.memory_space<vmem>>, %arg4: memref<256x128xf32, #tpu.memory_space<vmem>>, %arg5: memref<1x128xf32, #tpu.memory_space<vmem>>, %arg6: memref<1x128xf32, #tpu.memory_space<vmem>>) attributes {dimension_semantics = [#tpu.dimension_semantics<parallel>], iteration_bounds = array<i64: 1>, scalar_prefetch = 0 : i64, scratch_operands = 0 : i64, tpu.core_type = #tpu.core_type<tc>, window_params = [{transform_indices = @transform_0, window_bounds = array<i64: 1, 256>}, {pipeline_mode = #tpu.pipeline_mode<synchronous>, transform_indices = @transform_1, window_bounds = array<i64: 256, 256>}, {pipeline_mode = #tpu.pipeline_mode<synchronous>, transform_indices = @transform_2, window_bounds = array<i64: 1, 256>}, {pipeline_mode = #tpu.pipeline_mode<synchronous>, transform_indices = @transform_3, window_bounds = array<i64: 256, 128>}, {pipeline_mode = #tpu.pipeline_mode<synchronous>, transform_indices = @transform_4, window_bounds = array<i64: 1, 128>}, {transform_indices = @transform_5, window_bounds = array<i64: 1, 128>}]} {
    %c0 = arith.constant 0 : index
    %c0_0 = arith.constant 0 : index
    %0 = vector.load %arg1[%c0, %c0_0] : memref<1x256xf32, #tpu.memory_space<vmem>>, vector<1x256xf32>
    %c0_1 = arith.constant 0 : index
    %c0_2 = arith.constant 0 : index
    %1 = vector.load %arg2[%c0_1, %c0_2] : memref<256x256xf32, #tpu.memory_space<vmem>>, vector<256x256xf32>
    %cst = arith.constant dense<0.000000e+00> : vector<1x256xf32>
    %2 = tpu.matmul %0, %1, %cst {dimension_numbers = #tpu.dot_dimension_numbers<[1], [0], [0], [1], [0, 0, 1, 1], [], []>} : vector<1x256xf32>, vector<256x256xf32>, vector<1x256xf32> -> vector<1x256xf32>
    %c0_3 = arith.constant 0 : index
    %c0_4 = arith.constant 0 : index
    %3 = vector.load %arg3[%c0_3, %c0_4] : memref<1x256xf32, #tpu.memory_space<vmem>>, vector<1x256xf32>
    %4 = arith.addf %2, %3 : vector<1x256xf32>
    %c0_5 = arith.constant 0 : index
    %c0_6 = arith.constant 0 : index
    %5 = vector.load %arg4[%c0_5, %c0_6] : memref<256x128xf32, #tpu.memory_space<vmem>>, vector<256x128xf32>
    %cst_7 = arith.constant dense<0.000000e+00> : vector<1x128xf32>
    %6 = tpu.matmul %4, %5, %cst_7 {dimension_numbers = #tpu.dot_dimension_numbers<[1], [0], [0], [1], [0, 0, 1, 1], [], []>} : vector<1x256xf32>, vector<256x128xf32>, vector<1x128xf32> -> vector<1x128xf32>
    %c0_8 = arith.constant 0 : index
    %c0_9 = arith.constant 0 : index
    %7 = vector.load %arg5[%c0_8, %c0_9] : memref<1x128xf32, #tpu.memory_space<vmem>>, vector<1x128xf32>
    %8 = arith.addf %6, %7 : vector<1x128xf32>
    %9 = arith.negf %8 : vector<1x128xf32>
    %10 = math.exp %9 : vector<1x128xf32>
    %cst_10 = arith.constant 1.000000e+00 : f32
    %11 = vector.broadcast %cst_10 : f32 to vector<1x128xf32>
    %12 = arith.addf %11, %10 : vector<1x128xf32>
    %13 = arith.divf %11, %12 : vector<1x128xf32>
    %c0_11 = arith.constant 0 : index
    %c0_12 = arith.constant 0 : index
    %14 = vector.load %arg6[%c0_11, %c0_12] : memref<1x128xf32, #tpu.memory_space<vmem>>, vector<1x128xf32>
    tpu.vector_store %arg6[%c0_11, %c0_12], %13 {strides = array<i32>} : memref<1x128xf32, #tpu.memory_space<vmem>>, vector<1x128xf32>,
    return
  }
  func.func @transform_0(%arg0: i32) -> (i32, i32) {
    %c0_i32 = arith.constant 0 : i32
    %c0_i32_0 = arith.constant 0 : i32
    return %arg0, %c0_i32 : i32, i32
  }
  func.func @transform_1(%arg0: i32) -> (i32, i32) {
    %c0_i32 = arith.constant 0 : i32
    %c0_i32_0 = arith.constant 0 : i32
    %c0_i32_1 = arith.constant 0 : i32
    return %c0_i32, %c0_i32_0 : i32, i32
  }
  func.func @transform_2(%arg0: i32) -> (i32, i32) {
    %c0_i32 = arith.constant 0 : i32
    %c0_i32_0 = arith.constant 0 : i32
    %c0_i32_1 = arith.constant 0 : i32
    return %c0_i32, %c0_i32_0 : i32, i32
  }
  func.func @transform_3(%arg0: i32) -> (i32, i32) {
    %c0_i32 = arith.constant 0 : i32
    %c0_i32_0 = arith.constant 0 : i32
    %c0_i32_1 = arith.constant 0 : i32
    return %c0_i32, %c0_i32_0 : i32, i32
  }
  func.func @transform_4(%arg0: i32) -> (i32, i32) {
    %c0_i32 = arith.constant 0 : i32
    %c0_i32_0 = arith.constant 0 : i32
    %c0_i32_1 = arith.constant 0 : i32
    return %c0_i32, %c0_i32_0 : i32, i32
  }
  func.func @transform_5(%arg0: i32) -> (i32, i32) {
    %c0_i32 = arith.constant 0 : i32
    %c0_i32_0 = arith.constant 0 : i32
    return %arg0, %c0_i32 : i32, i32
  }
}

</mosaic_0001>

<bundles_post_ra>
// kernel: tpu_custom_call.1
= control target key start
LH: loop header
LB: loop body
LE: loop exit
PB: predicated region body
PF: predicated region fallthrough
CT: control target
= control target key end

     0   :  { %10 = vsyncpa [#allocation3], 0  ;;  %s687_s0 = inlined_call_operand.hbm [shape: f32[1,256], index: 0, kind: input, shape index: {}]   ;;  %s688_s1 = inlined_call_operand.hbm [shape: f32[256,256], index: 1, kind: input, shape index: {}]   ;;  %s689_s2 = inlined_call_operand.vmem [shape: f32[1,256], index: 2, kind: input, shape index: {}]   ;;  %s690_s3 = inlined_call_operand.hbm [shape: f32[256,128], index: 3, kind: input, shape index: {}]   ;;  %s691_s4 = inlined_call_operand.vmem [shape: f32[1,128], index: 4, kind: input, shape index: {}]   ;;  %s692_s5 = inlined_call_operand.hbm [shape: f32[1,128], index: 5, kind: output, shape index: {}]  }
   0x1   :  { %11 = vsyncpa [#allocation6], 0 }
   0x2   :  { %12 = vsyncpa [#allocation4], 0  ;;  %s583_s18 = smov [#allocation5]   ;;  %s489_s22 = scalar_lea.hbm %s688_s1, 8192 }
   0x3   :  { %s28_s19 = sshll.u32 %s583_s18, 4  ;;  %p490_p0 = scmp.ne.s32.totalorder %s688_s1, %s489_s22  ;;  %s29_s19 = int_to_ptr.vmem [resolvable:$true] %s28_s19 }
   0x4   :  { %p493_p1 = scmp.lt.u32.totalorder %s489_s22, %s688_s1 }
   0x6   :  { %p495_p2 = pnand %p493_p1, %p490_p0 }
   0x8   :  { %498 = shalt.err (!%p495_p2)
}
   0x9   :  { %s499_s27 = scalar_lea.vmem %s29_s19, 8192  ;;  %p504_p4 = scmp.lt.s32.totalorder %s29_s19, %s29_s19 }
   0xa   :  { %p500_p3 = scmp.ne.s32.totalorder %s29_s19, %s499_s27  ;;  %p505_p5 = scmp.lt.s32.totalorder %s499_s27, %s499_s27 }
   0xc   :  { %p506_p6 = por %p505_p5, %p504_p4 }
   0xe   :  { %p507_p7 = pnand %p506_p6, %p500_p3 }
  0x10   :  { %510 = shalt.err (!%p507_p7)
}
  0x11   :  { %s584_s28 = smov 256   ;;  %s585_s29 = smov 16  }
  0x12   :  { %34 = dma.hbm_to_vmem [thread:$0]  %s688_s1, 8192, %s29_s19, [#allocation6], %s584_s28, %s584_s28, %s585_s29  }
  0x13   :  { %s586_s7 = smov [#allocation2]   ;;  %s587_s9 = smov [#allocation7]  }
  0x14   :  { %s19_s8 = sshll.u32 %s586_s7, 4  ;;  %s42_s10 = sshll.u32 %s587_s9, 4  ;;  %s20_s8 = int_to_ptr.vmem [resolvable:$true] %s19_s8  ;;  %s43_s10 = int_to_ptr.vmem [resolvable:$true] %s42_s10 }
  0x15   :  { %s511_s13 = scalar_lea.hbm %s687_s0, 32 }
  0x16   :  { %p512_p8 = scmp.ne.s32.totalorder %s687_s0, %s511_s13  ;;  %p515_p9 = scmp.lt.u32.totalorder %s511_s13, %s687_s0 }
  0x18   :  { %p517_p10 = pnand %p515_p9, %p512_p8 }
  0x1a   :  { %520 = shalt.err (!%p517_p10)
}
  0x1b   :  { %s521_s1 = scalar_lea.vmem %s20_s8, 32  ;;  %p526_p12 = scmp.lt.s32.totalorder %s20_s8, %s20_s8 }
  0x1c   :  { %p522_p11 = scmp.ne.s32.totalorder %s20_s8, %s521_s1  ;;  %p527_p13 = scmp.lt.s32.totalorder %s521_s1, %s521_s1 }
  0x1e   :  { %p528_p0 = por %p527_p13, %p526_p12 }
  0x20   :  { %p529_p1 = pnand %p528_p0, %p522_p11 }
  0x22   :  { %532 = shalt.err (!%p529_p1)
}
  0x23   :  { %22 = dma.hbm_to_vmem [thread:$0]  %s687_s0, 32, %s20_s8, [#allocation3]  }
  0x24   :  { %s533_s22 = scalar_lea.hbm %s690_s3, 4096 }
  0x25   :  { %p534_p2 = scmp.ne.s32.totalorder %s690_s3, %s533_s22  ;;  %p537_p3 = scmp.lt.u32.totalorder %s533_s22, %s690_s3 }
  0x27   :  { %p539_p4 = pnand %p537_p3, %p534_p2 }
  0x29   :  { %542 = shalt.err (!%p539_p4)
}
  0x2a   :  { %s543_s27 = scalar_lea.vmem %s43_s10, 4096  ;;  %p548_p6 = scmp.lt.s32.totalorder %s43_s10, %s43_s10 }
  0x2b   :  { %p544_p5 = scmp.ne.s32.totalorder %s43_s10, %s543_s27  ;;  %p549_p7 = scmp.lt.s32.totalorder %s543_s27, %s543_s27 }
  0x2d   :  { %p550_p8 = por %p549_p7, %p548_p6 }
  0x2f   :  { %p551_p9 = pnand %p550_p8, %p544_p5 }
  0x31   :  { %554 = shalt.err (!%p551_p9)
}
  0x32   :  { %s588_s0 = smov 128   ;;  %s589_s28 = smov 8  }
  0x33   :  { %48 = dma.hbm_to_vmem [thread:$0]  %s690_s3, 4096, %s43_s10, [#allocation6], %s588_s0, %s588_s0, %s589_s28  }
  0x34   :  { %577 = dma.done.wait [#allocation3], 32  }
  0x35   :  { %578 = vsyncadd [#allocation3], 4294967264 }
  0x36   :  { %579 = dma.done.wait [#allocation6], 12288  }
  0x37   :  { %580 = vsyncadd [#allocation6], 4294955008  ;;  %v62_v0 = vld [vmem:[#allocation5 + $0x8] sm:$0xff]  ;;  %v64_v1 = vld [vmem:[#allocation5 + $0x18] sm:$0xff]  ;;  %v127_v25 = vlaneseq }
  0x38   :  { %v61_v2 = vld [vmem:[#allocation5] sm:$0xff]  ;;  %v381_v3 = vpack.c.bf16 %v64_v1, %v62_v0  ;;  %v63_v4 = vld [vmem:[#allocation5 + $0x10] sm:$0xff]  ;;  %v66_v5 = vld [vmem:[#allocation5 + $0x28] sm:$0xff] }
  0x39   :  { %v68_v6 = vld [vmem:[#allocation5 + $0x38] sm:$0xff]  ;;  %v383_v7 = vpack.c.bf16 %v63_v4, %v61_v2  ;;  %v65_v9 = vld [vmem:[#allocation5 + $0x20] sm:$0xff]  ;;  %v67_v10 = vld [vmem:[#allocation5 + $0x30] sm:$0xff]  ;;  %v657_v32 = vshrl.u32 %v127_v25, 7 }
  0x3a   :  { %v385_v8 = vpack.c.bf16 %v68_v6, %v66_v5  ;;  %v70_v11 = vld [vmem:[#allocation5 + $0x48] sm:$0xff]  ;;  %382 = vmatprep.subr.bf16.mxu0 %v381_v3  ;;  %v72_v12 = vld [vmem:[#allocation5 + $0x58] sm:$0xff]  ;;  %v387_v13 = vpack.c.bf16 %v67_v10, %v65_v9  ;;  %v69_v15 = vld [vmem:[#allocation5 + $0x40] sm:$0xff] }
  0x3b   :  { %384 = vmatpush1.bf16.msra.mxu0 %v383_v7  ;;  %v389_v14 = vpack.c.bf16 %v72_v12, %v70_v11  ;;  %v71_v16 = vld [vmem:[#allocation5 + $0x50] sm:$0xff]  ;;  %v74_v17 = vld [vmem:[#allocation5 + $0x68] sm:$0xff]  ;;  %v76_v18 = vld [vmem:[#allocation5 + $0x78] sm:$0xff]  ;;  %v133_v39 = vsub.s32 1, %v657_v32 }
  0x3c   :  { %386 = vmatprep.subr.bf16.mxu0 %v385_v8  ;;  %v391_v19 = vpack.c.bf16 %v71_v16, %v69_v15  ;;  %v393_v20 = vpack.c.bf16 %v76_v18, %v74_v17  ;;  %v73_v21 = vld [vmem:[#allocation5 + $0x60] sm:$0xff]  ;;  %v75_v22 = vld [vmem:[#allocation5 + $0x70] sm:$0xff]  ;;  %v78_v23 = vld [vmem:[#allocation5 + $0x88] sm:$0xff] }
  0x3d   :  { %v80_v24 = vld [vmem:[#allocation5 + $0x98] sm:$0xff]  ;;  %v395_v26 = vpack.c.bf16 %v75_v22, %v73_v21  ;;  %v77_v28 = vld [vmem:[#allocation5 + $0x80] sm:$0xff]  ;;  %v79_v29 = vld [vmem:[#allocation5 + $0x90] sm:$0xff] }
  0x3e   :  { %v397_v27 = vpack.c.bf16 %v80_v24, %v78_v23  ;;  %v82_v30 = vld [vmem:[#allocation5 + $0xa8] sm:$0xff]  ;;  %v84_v31 = vld [vmem:[#allocation5 + $0xb8] sm:$0xff]  ;;  %v399_v33 = vpack.c.bf16 %v79_v29, %v77_v28  ;;  %v81_v35 = vld [vmem:[#allocation5 + $0xa0] sm:$0xff] }
  0x3f   :  { %388 = vmatpush1.bf16.msra.mxu0 %v387_v13  ;;  %v401_v34 = vpack.c.bf16 %v84_v31, %v82_v30  ;;  %v83_v36 = vld [vmem:[#allocation5 + $0xb0] sm:$0xff]  ;;  %v86_v37 = vld [vmem:[#allocation5 + $0xc8] sm:$0xff]  ;;  %v88_v38 = vld [vmem:[#allocation5 + $0xd8] sm:$0xff] }
  0x40   :  { %390 = vmatprep.subr.bf16.mxu0 %v389_v14  ;;  %v403_v40 = vpack.c.bf16 %v83_v36, %v81_v35  ;;  %v85_v41 = vld [vmem:[#allocation5 + $0xc0] sm:$0xff]  ;;  %v87_v42 = vld [vmem:[#allocation5 + $0xd0] sm:$0xff]  ;;  %v90_v43 = vld [vmem:[#allocation5 + $0xe8] sm:$0xff]  ;;  %v405_v44 = vpack.c.bf16 %v88_v38, %v86_v37 }
  0x41   :  { %v92_v45 = vld [vmem:[#allocation5 + $0xf8] sm:$0xff]  ;;  %v235_v47 = vld [vmem:[#allocation7 + $0x80] sm:$0xff]  ;;  %v236_v49 = vld [vmem:[#allocation7 + $0x88] sm:$0xff]  ;;  %v407_v57 = vpack.c.bf16 %v87_v42, %v85_v41 }
  0x42   :  { %v660_v46 = vld [vmem:[#allocation2] sm:$0x3]  ;;  %v219_v50 = vld [vmem:[#allocation7] sm:$0xff]  ;;  %v220_v51 = vld [vmem:[#allocation7 + $0x8] sm:$0xff]  ;;  %v445_v52 = vpack.c.bf16 %v236_v49, %v235_v47  ;;  %v409_v62 = vpack.c.bf16 %v92_v45, %v90_v43 }
  0x43   :  { %392 = vmatpush1.bf16.msra.mxu0 %v391_v19  ;;  %v134_v48 = vrot.slane %v660_v46, %v133_v39  ;;  %v447_v53 = vpack.c.bf16 %v220_v51, %v219_v50  ;;  %v237_v54 = vld [vmem:[#allocation7 + $0x90] sm:$0xff]  ;;  %v238_v55 = vld [vmem:[#allocation7 + $0x98] sm:$0xff]  ;;  %v239_v60 = vld [vmem:[#allocation7 + $0xa0] sm:$0xff] }
  0x44   :  { %394 = vmatprep.subr.bf16.mxu0 %v393_v20  ;;  %v221_v56 = vld [vmem:[#allocation7 + $0x10] sm:$0xff]  ;;  %v449_v58 = vpack.c.bf16 %v238_v55, %v237_v54  ;;  %v222_v59 = vld [vmem:[#allocation7 + $0x18] sm:$0xff]  ;;  %v240_v61 = vld [vmem:[#allocation7 + $0xa8] sm:$0xff]  ;;  %446 = vmatprep.subr.bf16.mxu1 %v445_v52 }
  0x45   :  { %212 = vmatprep.mubr.f32.mxu0 %v134_v48  ;;  %v89_v63 = vld [vmem:[#allocation5 + $0xe0] sm:$0xff]  ;;  %v91_v0 = vld [vmem:[#allocation5 + $0xf0] sm:$0xff]  ;;  %v94_v1 = vld [vmem:[#allocation5 + $0x108] sm:$0xff]  ;;  %448 = vmatpush3.bf16.msra.mxu1 %v447_v53  ;;  %v451_v3 = vpack.c.bf16 %v222_v59, %v221_v56  ;;  %v453_v4 = vpack.c.bf16 %v240_v61, %v239_v60 }
  0x46   :  { %v96_v2 = vld [vmem:[#allocation5 + $0x118] sm:$0xff]  ;;  %450 = vmatprep.subr.bf16.mxu1 %v449_v58  ;;  %v223_v5 = vld [vmem:[#allocation7 + $0x20] sm:$0xff]  ;;  %v224_v6 = vld [vmem:[#allocation7 + $0x28] sm:$0xff]  ;;  %v411_v7 = vpack.c.bf16 %v91_v0, %v89_v63 }
  0x47   :  { %396 = vmatpush1.bf16.msra.mxu0 %v395_v26  ;;  %v241_v8 = vld [vmem:[#allocation7 + $0xb0] sm:$0xff]  ;;  %v242_v9 = vld [vmem:[#allocation7 + $0xb8] sm:$0xff]  ;;  %v413_v10 = vpack.c.bf16 %v96_v2, %v94_v1  ;;  %v93_v11 = vld [vmem:[#allocation5 + $0x100] sm:$0xff]  ;;  %v455_v15 = vpack.c.bf16 %v224_v6, %v223_v5 }
  0x48   :  { %398 = vmatprep.subr.bf16.mxu0 %v397_v27  ;;  %v95_v12 = vld [vmem:[#allocation5 + $0x110] sm:$0xff]  ;;  %v98_v13 = vld [vmem:[#allocation5 + $0x128] sm:$0xff]  ;;  %v100_v14 = vld [vmem:[#allocation5 + $0x138] sm:$0xff]  ;;  %v457_v16 = vpack.c.bf16 %v242_v9, %v241_v8 }
  0x49   :  { %452 = vmatpush3.bf16.msra.mxu1 %v451_v3  ;;  %v225_v17 = vld [vmem:[#allocation7 + $0x30] sm:$0xff]  ;;  %v226_v18 = vld [vmem:[#allocation7 + $0x38] sm:$0xff]  ;;  %v415_v19 = vpack.c.bf16 %v95_v12, %v93_v11  ;;  %v243_v20 = vld [vmem:[#allocation7 + $0xc0] sm:$0xff]  ;;  %v417_v22 = vpack.c.bf16 %v100_v14, %v98_v13 }
  0x4a   :  { %454 = vmatprep.subr.bf16.mxu1 %v453_v4  ;;  %v244_v21 = vld [vmem:[#allocation7 + $0xc8] sm:$0xff]  ;;  %v97_v23 = vld [vmem:[#allocation5 + $0x120] sm:$0xff]  ;;  %v99_v24 = vld [vmem:[#allocation5 + $0x130] sm:$0xff]  ;;  %v459_v27 = vpack.c.bf16 %v226_v18, %v225_v17  ;;  %v129_v17 = vsub.s32 0, %v657_v32 }
  0x4b   :  { %400 = vmatpush1.bf16.msra.mxu0 %v399_v33  ;;  %v102_v25 = vld [vmem:[#allocation5 + $0x148] sm:$0xff]  ;;  %v104_v26 = vld [vmem:[#allocation5 + $0x158] sm:$0xff]  ;;  %v461_v28 = vpack.c.bf16 %v244_v21, %v243_v20  ;;  %v227_v29 = vld [vmem:[#allocation7 + $0x40] sm:$0xff]  ;;  %v419_v31 = vpack.c.bf16 %v99_v24, %v97_v23 }
  0x4c   :  { %402 = vmatprep.subr.bf16.mxu0 %v401_v34  ;;  %v228_v30 = vld [vmem:[#allocation7 + $0x48] sm:$0xff]  ;;  %v245_v33 = vld [vmem:[#allocation7 + $0xd0] sm:$0xff]  ;;  %v246_v34 = vld [vmem:[#allocation7 + $0xd8] sm:$0xff]  ;;  %v421_v35 = vpack.c.bf16 %v104_v26, %v102_v25 }
  0x4d   :  { %456 = vmatpush3.bf16.msra.mxu1 %v455_v15  ;;  %v101_v36 = vld [vmem:[#allocation5 + $0x140] sm:$0xff]  ;;  %v103_v37 = vld [vmem:[#allocation5 + $0x150] sm:$0xff]  ;;  %v106_v38 = vld [vmem:[#allocation5 + $0x168] sm:$0xff]  ;;  %v463_v41 = vpack.c.bf16 %v228_v30, %v227_v29  ;;  %v465_v42 = vpack.c.bf16 %v246_v34, %v245_v33 }
  0x4e   :  { %458 = vmatprep.subr.bf16.mxu1 %v457_v16  ;;  %v229_v43 = vld [vmem:[#allocation7 + $0x50] sm:$0xff]  ;;  %v423_v45 = vpack.c.bf16 %v103_v37, %v101_v36  ;;  %v247_v47 = vld [vmem:[#allocation7 + $0xe0] sm:$0xff]  ;;  %v248_v48 = vld [vmem:[#allocation7 + $0xe8] sm:$0xff] }
  0x4f   :  { %404 = vmatpush1.bf16.msra.mxu0 %v403_v40  ;;  %v108_v40 = vld [vmem:[#allocation5 + $0x178] sm:$0xff]  ;;  %v105_v50 = vld [vmem:[#allocation5 + $0x160] sm:$0xff]  ;;  %v107_v51 = vld [vmem:[#allocation5 + $0x170] sm:$0xff]  ;;  %v469_v55 = vpack.c.bf16 %v248_v48, %v247_v47 }
  0x50   :  { %406 = vmatprep.subr.bf16.mxu0 %v405_v44  ;;  %v230_v44 = vld [vmem:[#allocation7 + $0x58] sm:$0xff]  ;;  %v425_v49 = vpack.c.bf16 %v108_v40, %v106_v38  ;;  %v110_v52 = vld [vmem:[#allocation5 + $0x188] sm:$0xff]  ;;  %v231_v56 = vld [vmem:[#allocation7 + $0x60] sm:$0xff]  ;;  %v427_v58 = vpack.c.bf16 %v107_v51, %v105_v50 }
  0x51   :  { %460 = vmatpush3.bf16.msra.mxu1 %v459_v27  ;;  %v112_v53 = vld [vmem:[#allocation5 + $0x198] sm:$0xff]  ;;  %v467_v54 = vpack.c.bf16 %v230_v44, %v229_v43  ;;  %v109_v60 = vld [vmem:[#allocation5 + $0x180] sm:$0xff]  ;;  %v111_v61 = vld [vmem:[#allocation5 + $0x190] sm:$0xff] }
  0x52   :  { %462 = vmatprep.subr.bf16.mxu1 %v461_v28  ;;  %v429_v59 = vpack.c.bf16 %v112_v53, %v110_v52  ;;  %v116_v63 = vld [vmem:[#allocation5 + $0x1b8] sm:$0xff]  ;;  %v431_v1 = vpack.c.bf16 %v111_v61, %v109_v60  ;;  %v113_v3 = vld [vmem:[#allocation5 + $0x1a0] sm:$0xff]  ;;  %v115_v4 = vld [vmem:[#allocation5 + $0x1b0] sm:$0xff] }
  0x53   :  { %408 = vmatpush1.bf16.msra.mxu0 %v407_v57  ;;  %v232_v57 = vld [vmem:[#allocation7 + $0x68] sm:$0xff]  ;;  %v120_v6 = vld [vmem:[#allocation5 + $0x1d8] sm:$0xff]  ;;  %v117_v9 = vld [vmem:[#allocation5 + $0x1c0] sm:$0xff] }
  0x54   :  { %410 = vmatprep.subr.bf16.mxu0 %v409_v62  ;;  %v114_v62 = vld [vmem:[#allocation5 + $0x1a8] sm:$0xff]  ;;  %v471_v0 = vpack.c.bf16 %v232_v57, %v231_v56  ;;  %v124_v12 = vld [vmem:[#allocation5 + $0x1f8] sm:$0xff]  ;;  %v121_v15 = vld [vmem:[#allocation5 + $0x1e0] sm:$0xff] }
  0x55   :  { %464 = vmatpush3.bf16.msra.mxu1 %v463_v41  ;;  %v433_v2 = vpack.c.bf16 %v116_v63, %v114_v62  ;;  %v118_v5 = vld [vmem:[#allocation5 + $0x1c8] sm:$0xff]  ;;  %v123_v16 = vld [vmem:[#allocation5 + $0x1f0] sm:$0xff]  ;;  %v250_v21 = vld [vmem:[#allocation7 + $0xf8] sm:$0xff] }
  0x56   :  { %466 = vmatprep.subr.bf16.mxu1 %v465_v42  ;;  %v437_v8 = vpack.c.bf16 %v120_v6, %v118_v5  ;;  %v122_v11 = vld [vmem:[#allocation5 + $0x1e8] sm:$0xff]  ;;  %v443_v18 = vpack.c.bf16 %v123_v16, %v121_v15  ;;  %v249_v20 = vld [vmem:[#allocation7 + $0xf0] sm:$0xff]  ;;  %v234_v24 = vld [vmem:[#allocation7 + $0x78] sm:$0xff] }
  0x57   :  { %412 = vmatpush1.bf16.msra.mxu0 %v411_v7  ;;  %v435_v7 = vpack.c.bf16 %v115_v4, %v113_v3  ;;  %v441_v14 = vpack.c.bf16 %v124_v12, %v122_v11  ;;  %v233_v23 = vld [vmem:[#allocation7 + $0x70] sm:$0xff]  ;;  %v125_v26 = vld [vmem:[%s689_s2] sm:$0x3]  ;;  %s590_s2 = smov [#allocation8]  }
  0x58   :  { %414 = vmatprep.subr.bf16.mxu0 %v413_v10  ;;  %v119_v10 = vld [vmem:[#allocation5 + $0x1d0] sm:$0xff]  ;;  %v475_v25 = vpack.c.bf16 %v234_v24, %v233_v23  ;;  %v141_v27 = vrot.slane %v125_v26, %v129_v17  ;;  %v145_v28 = vrot.slane %v125_v26, %v133_v39  ;;  %v251_v34 = vld [vmem:[%s691_s4] sm:$0x1]  ;;  %s335_s9 = sshll.u32 %s590_s2, 4  ;;  %s336_s9 = int_to_ptr.vmem [resolvable:$true] %s335_s9 }
  0x59   :  { %468 = vmatpush3.bf16.msra.mxu1 %v467_v54  ;;  %v439_v13 = vpack.c.bf16 %v119_v10, %v117_v9  ;;  %s555_s10 = scalar_lea.vmem %s336_s9, 16  ;;  %s559_s11 = scalar_lea.vmem %s336_s9, 32 }
  0x5a   :  { %470 = vmatprep.subr.bf16.mxu1 %v469_v55  ;;  %p556_p10 = scmp.ne.s32.totalorder %s336_s9, %s555_s10  ;;  %p560_p11 = scmp.lt.s32.totalorder %s336_s9, %s336_s9 }
  0x5b   :  { %416 = vmatpush1.bf16.msra.mxu0 %v415_v19  ;;  %v130_v19 = vrot.slane %v660_v46, %v129_v17  ;;  %p561_p12 = scmp.lt.s32.totalorder %s559_s11, %s555_s10 }
  0x5c   :  { %418 = vmatprep.subr.bf16.mxu0 %v417_v22  ;;  %v473_v22 = vpack.c.bf16 %v250_v21, %v249_v20 }
  0x5d   :  { %472 = vmatpush3.bf16.msra.mxu1 %v471_v0  ;;  %p562_p13 = por %p561_p12, %p560_p11 }
  0x5e   :  { %474 = vmatprep.subr.bf16.mxu1 %v473_v22 }
  0x5f   :  { %420 = vmatpush1.bf16.msra.mxu0 %v419_v31  ;;  %p563_p0 = pnand %p562_p13, %p556_p10 }
  0x60   :  { %422 = vmatprep.subr.bf16.mxu0 %v421_v35 }
  0x61   :  { %476 = vmatpush3.bf16.msra.mxu1 %v475_v25 }
  0x63   :  { %424 = vmatpush1.bf16.msra.mxu0 %v423_v45 }
  0x64   :  { %426 = vmatprep.subr.bf16.mxu0 %v425_v49 }
  0x67   :  { %428 = vmatpush1.bf16.msra.mxu0 %v427_v58 }
  0x68   :  { %430 = vmatprep.subr.bf16.mxu0 %v429_v59 }
  0x6b   :  { %432 = vmatpush1.bf16.msra.mxu0 %v431_v1 }
  0x6c   :  { %434 = vmatprep.subr.bf16.mxu0 %v433_v2 }
  0x6f   :  { %436 = vmatpush1.bf16.msra.mxu0 %v435_v7 }
  0x70   :  { %438 = vmatprep.subr.bf16.mxu0 %v437_v8 }
  0x73   :  { %440 = vmatpush1.bf16.msra.mxu0 %v439_v13 }
  0x74   :  { %442 = vmatprep.subr.bf16.mxu0 %v441_v14 }
  0x77   :  { %444 = vmatpush1.bf16.msra.mxu0 %v443_v18 }
  0x7a   :  { %213 = vmatmul.mubr.f32.vlgmr.msra.gmra.mrb[0].mxu0 %v130_v19 }
 0x14d   :  { %v214_v29 = vpop.f32.mrb[0].mxu0 }
 0x14e   :  { %v215_v46 = vadd.f32 %v214_v29, %v141_v27  ;;  %v216_v30 = vpop.f32.mrb[1].mxu0 }
 0x14f   :  { %v217_v31 = vadd.f32 %v216_v30, %v145_v28 }
 0x151   :  { %316 = vmatprep.mubr.f32.mxu1 %v217_v31 }
 0x152   :  { %317 = vmatmul.mubr.f32.vlgmr.msra.gmra.mrb[0].mxu1 %v215_v46 }
 0x225   :  { %v378_v33 = vpop.f32.mrb[0].mxu1 }
 0x226   :  { %v379_v35 = vpop.f32.mrb[1].mxu1 }
 0x227   :  { %v380_v36 = vadd.f32 %v379_v35, %v378_v33 }
 0x229   :  { %v319_v37 = vadd.f32 %v380_v36, %v251_v34 }
 0x22b   :  { %v345_v38 = vmul.f32 -1.442695, %v319_v37 }
 0x22d   :  { %485 = vpow2.f32 %v345_v38 }
 0x237   :  { %v486_v40 = vpop.eup %485 }
 0x238   :  { %v325_v41 = vadd.f32 1.0, %v486_v40 }
 0x23a   :  { %487 = vrcp.f32 %v325_v41 }
 0x244   :  { %v488_v32 = vpop.eup %487 }
 0x245   :  { %328 = vst [vmem:[#allocation8] sm:$0x1] %v488_v32 }
 0x246   :  { %566 = shalt.err (!%p563_p0)
}
 0x247   :  { %s567_s13 = scalar_lea.hbm %s692_s5, 16 }
 0x248   :  { %p568_p1 = scmp.ne.s32.totalorder %s692_s5, %s567_s13  ;;  %p571_p2 = scmp.lt.u32.totalorder %s567_s13, %s692_s5 }
 0x24a   :  { %p573_p3 = pnand %p571_p2, %p568_p1 }
 0x24c   :  { %576 = shalt.err (!%p573_p3)
}
 0x24d   :  { %338 = dma.vmem_to_hbm [thread:$0]  %s336_s9, 16, %s692_s5, [#allocation4]  }
 0x24e   :  { %581 = dma.done.wait [#allocation4], 16  }
 0x24f   :  { %582 = vsyncadd [#allocation4], 4294967280 }
 0x250   :  { %342 = vsyncpa [#allocation3], 1 }
 0x251   :  { %343 = vsyncpa [#allocation6], 1 }
 0x252   :  { %344 = vsyncpa [#allocation4], 1 }

</bundles_post_ra>
